<compile_context>
chip_gen: v5e
topology: v5e:2x2
jax: 0.10.0
libtpu: 0.0.40
codegen_flags: <defaults>
</compile_context>

<pallas_src>
import functools
import math

import jax
import jax.numpy as jnp
import numpy as np
from jax.experimental import pallas as pl
from jax.experimental.pallas import tpu as pltpu


def _round_up(n, m):
    return ((n + m - 1) // m) * m


def _arc_margin_kernel(*refs, scale, cos_m, sin_m, th, mm, ls_eps, easy_margin,
                       num_classes, num_padded_classes, return_logits):
    if return_logits:
        (x_ref, w_ref, w_inv_ref, label_ref, out_ref, nll_ref,
         x_inv_sc, m_sc, l_sc, t_sc) = refs
    else:
        (x_ref, w_ref, w_inv_ref, label_ref, nll_ref,
         x_inv_sc, m_sc, l_sc, t_sc) = refs
        out_ref = None

    j = pl.program_id(1)
    n_j = pl.num_programs(1)

    @pl.when(j == 0)
    def _init():
        # x tile is resident across the class axis: compute its inverse L2
        # norm once per B tile (rsqrt on the squared sum -> EUP).
        x_f = x_ref[...].astype(jnp.float32)
        x_inv_sc[...] = jax.lax.rsqrt(
            jnp.maximum(jnp.sum(x_f * x_f, axis=-1, keepdims=True), 1e-24))
        m_sc[...] = jnp.full(m_sc.shape, -jnp.inf, dtype=jnp.float32)
        l_sc[...] = jnp.zeros(l_sc.shape, dtype=jnp.float32)
        t_sc[...] = jnp.zeros(t_sc.shape, dtype=jnp.float32)

    # Raw matmul on the MXU (f32 accumulation), then fold both L2 norms in as
    # a single broadcast rescale of the accumulator.
    raw = jax.lax.dot_general(
        x_ref[...], w_ref[...], dimension_numbers=(((1,), (1,)), ((), ())),
        preferred_element_type=jnp.float32)                 # (TB, TC) f32
    # TODO(synk): if the Mosaic bundle shows a per-step vxpose of the weight
    # tile, switch to a pre-transposed (D, C) weight layout.
    cosine = raw * x_inv_sc[...] * w_inv_ref[...]           # (TB,1)*(1,TC) bcast

    tb, tc = cosine.shape
    label = label_ref[...]                                  # (TB, 1) int32
    class_ids = j * tc + jax.lax.broadcasted_iota(jnp.int32, (tb, tc), 1)
    eq = class_ids == label                                 # (TB, TC) bool

    if ls_eps > 0.0:
        # Label smoothing touches every column -> full-tile phi path.
        sine = jnp.sqrt(jnp.clip(1.0 - cosine * cosine, 0.0, 1.0))
        phi = cosine * cos_m - sine * sin_m
        if easy_margin:
            phi = jnp.where(cosine > 0.0, phi, cosine)
        else:
            phi = jnp.where(cosine > th, phi, cosine - mm)
        off = ls_eps / float(num_classes)
        one_hot = jnp.where(eq, 1.0 - ls_eps + off, off)
        output = scale * (cosine + one_hot * (phi - cosine))
        target_logit = jnp.sum(jnp.where(eq, output, 0.0), axis=-1,
                               keepdims=True)
    else:
        # Hard labels: the margin only moves the label column, so phi is a
        # (TB,1) computation; full tile only pays one mul + one select.
        cos_t = jnp.sum(jnp.where(eq, cosine, 0.0), axis=-1, keepdims=True)
        in_tile = jnp.logical_and(label >= j * tc, label < (j + 1) * tc)
        sin_t = jnp.sqrt(jnp.clip(1.0 - cos_t * cos_t, 0.0, 1.0))
        phi_t = cos_t * cos_m - sin_t * sin_m
        if easy_margin:
            phi_t = jnp.where(cos_t > 0.0, phi_t, cos_t)
        else:
            phi_t = jnp.where(cos_t > th, phi_t, cos_t - mm)
        out_row = scale * phi_t                             # (TB, 1)
        output = jnp.where(eq, out_row, scale * cosine)
        target_logit = jnp.where(in_tile, out_row, 0.0)

    if return_logits:
        out_ref[...] = output.astype(out_ref.dtype)

    t_sc[...] = t_sc[...] + target_logit

    def lse_update(logits):
        m_prev = m_sc[...]
        m_new = jnp.maximum(m_prev, jnp.max(logits, axis=-1, keepdims=True))
        l_sc[...] = (l_sc[...] * jnp.exp(m_prev - m_new)
                     + jnp.sum(jnp.exp(logits - m_new), axis=-1, keepdims=True))
        m_sc[...] = m_new

    if num_padded_classes > num_classes:
        # Padded classes only exist in the final class tile: guard the
        # full-tile compare+select so it only runs on that step.
        is_last = j == n_j - 1

        @pl.when(is_last)
        def _masked():
            lse_update(jnp.where(class_ids < num_classes, output, -1e30))

        @pl.when(j != n_j - 1)
        def _unmasked():
            lse_update(output)
    else:
        lse_update(output)

    @pl.when(j == n_j - 1)
    def _finalize():
        nll_ref[...] = m_sc[...] + jnp.log(l_sc[...]) - t_sc[...]


def arc_margin_product(x, weight, label, *, scale=30.0, margin=0.5,
                       easy_margin=False, ls_eps=0.0,
                       block_b=256, block_c=1024, min_b_blocks=1,
                       return_logits=True, matmul_dtype=None):
    """Returns (logits, loss) (or just loss when return_logits=False).

    min_b_blocks: set to 2 on v7x (2 TensorCores/chip) so the "parallel" B
    grid axis has at least 2 blocks when B is small.
    matmul_dtype: e.g. jnp.bfloat16 to run the MXU in bf16 (halves weight DMA
    bytes); margin/softmax math stays f32.  Validate logits tolerance since
    scale amplifies cosine error.
    """
    B, D = x.shape
    C, D2 = weight.shape
    assert D == D2
    assert block_b % 8 == 0 and block_c % 128 == 0

    # Tile sizes: B tiles multiple of 8, C tiles multiple of 128 (lane-dense).
    tb = min(block_b, _round_up(B, 8))
    if min_b_blocks > 1:
        tb = max(8, min(tb, _round_up((B + min_b_blocks - 1) // min_b_blocks, 8)))
    tc = min(block_c, _round_up(C, 128))
    b_pad = _round_up(B, tb)
    c_pad = _round_up(C, tc)

    x_p = x if b_pad == B else jnp.pad(x, ((0, b_pad - B), (0, 0)))
    w_p = weight if c_pad == C else jnp.pad(weight, ((0, c_pad - C), (0, 0)))
    lab = label.astype(jnp.int32)
    lab_p = lab if b_pad == B else jnp.pad(lab, (0, b_pad - B))
    label2d = lab_p.reshape(b_pad, 1)

    # Per-class inverse L2 norms computed once (f32) and streamed as a tiny
    # (1, C_pad) side input; padded rows are zeros -> their cosine is 0 and
    # they are masked out of the softmax on the last class tile anyway.
    w_f32 = w_p.astype(jnp.float32)
    w_inv = jax.lax.rsqrt(
        jnp.maximum(jnp.sum(w_f32 * w_f32, axis=-1), 1e-24)).reshape(1, c_pad)

    if matmul_dtype is not None:
        x_p = x_p.astype(matmul_dtype)
        w_p = w_p.astype(matmul_dtype)

    kernel = functools.partial(
        _arc_margin_kernel,
        scale=float(scale),
        cos_m=math.cos(margin),
        sin_m=math.sin(margin),
        th=math.cos(math.pi - margin),
        mm=math.sin(math.pi - margin) * margin,
        ls_eps=float(ls_eps),
        easy_margin=bool(easy_margin),
        num_classes=C,
        num_padded_classes=c_pad,
        return_logits=bool(return_logits),
    )

    grid = (b_pad // tb, c_pad // tc)

    if return_logits:
        out_shape = (jax.ShapeDtypeStruct((b_pad, c_pad), x.dtype),
                     jax.ShapeDtypeStruct((b_pad, 1), jnp.float32))
        out_specs = (pl.BlockSpec((tb, tc), lambda i, j: (i, j)),   # logits
                     pl.BlockSpec((tb, 1), lambda i, j: (i, 0)))    # NLL
    else:
        out_shape = jax.ShapeDtypeStruct((b_pad, 1), jnp.float32)
        out_specs = pl.BlockSpec((tb, 1), lambda i, j: (i, 0))

    res = pl.pallas_call(
        kernel,
        out_shape=out_shape,
        grid_spec=pltpu.PrefetchScalarGridSpec(
            num_scalar_prefetch=0,
            grid=grid,
            in_specs=[
                pl.BlockSpec((tb, D), lambda i, j: (i, 0)),   # x: resident over C
                pl.BlockSpec((tc, D), lambda i, j: (j, 0)),   # weight: streamed
                pl.BlockSpec((1, tc), lambda i, j: (0, j)),   # per-class 1/||w||
                pl.BlockSpec((tb, 1), lambda i, j: (i, 0)),   # labels
            ],
            out_specs=out_specs,
            scratch_shapes=[
                pltpu.VMEM((tb, 1), jnp.float32),   # 1/||x|| (per B tile)
                pltpu.VMEM((tb, 1), jnp.float32),   # running max
                pltpu.VMEM((tb, 1), jnp.float32),   # running sum
                pltpu.VMEM((tb, 1), jnp.float32),   # target-logit accumulator
            ],
        ),
        compiler_params=pltpu.CompilerParams(
            dimension_semantics=("parallel", "arbitrary"),
            vmem_limit_bytes=48 * 1024 * 1024,
        ),
    )(x_p, w_p, w_inv, label2d)

    if return_logits:
        out, nll = res
        logits = out[:B, :C]
    else:
        nll = res
        logits = None

    # Mean over batch done in the wrapper (tiny reduce) so the B grid axis can
    # stay megacore-parallel without a racy scalar accumulator.
    loss = jnp.mean(nll[:B, 0])
    return (logits, loss) if return_logits else loss


def _reference(x, weight, label, *, scale=30.0, margin=0.5,
               easy_margin=False, ls_eps=0.0):
    cos_m, sin_m = math.cos(margin), math.sin(margin)
    th = math.cos(math.pi - margin)
    mm = math.sin(math.pi - margin) * margin
    x_n = x / jnp.maximum(jnp.linalg.norm(x, axis=-1, keepdims=True), 1e-12)
    w_n = weight / jnp.maximum(jnp.linalg.norm(weight, axis=-1, keepdims=True), 1e-12)
    cosine = x_n @ w_n.T
    sine = jnp.sqrt(jnp.clip(1.0 - cosine ** 2, 0.0, 1.0))
    phi = cosine * cos_m - sine * sin_m
    phi = jnp.where(cosine > 0, phi, cosine) if easy_margin else \
        jnp.where(cosine > th, phi, cosine - mm)
    one_hot = jax.nn.one_hot(label, weight.shape[0], dtype=jnp.float32)
    oh = (1 - ls_eps) * one_hot + ls_eps / weight.shape[0] if ls_eps > 0 else one_hot
    out = (oh * phi + (1.0 - oh) * cosine) * scale
    logp = jax.nn.log_softmax(out, axis=-1)
    loss = -jnp.mean(jnp.sum(one_hot * logp, axis=-1))
    return out, loss


if __name__ == "__main__":
    key = jax.random.PRNGKey(0)

    def run_case(B, D, C, *, scale=30.0, margin=0.5, easy_margin=False,
                 ls_eps=0.0, block_b=256, block_c=1024, min_b_blocks=1,
                 matmul_dtype=None, check=True):
        kx, kw, kl = jax.random.split(key, 3)
        x = jax.random.normal(kx, (B, D), dtype=jnp.float32)
        # xavier_uniform_ for weight of shape (out_features, in_features)
        bound = math.sqrt(6.0 / (D + C))
        weight = jax.random.uniform(kw, (C, D), minval=-bound, maxval=bound,
                                    dtype=jnp.float32)
        label = jax.random.randint(kl, (B,), 0, C, dtype=jnp.int32)

        out, loss = arc_margin_product(
            x, weight, label, scale=scale, margin=margin,
            easy_margin=easy_margin, ls_eps=ls_eps,
            block_b=block_b, block_c=block_c, min_b_blocks=min_b_blocks,
            matmul_dtype=matmul_dtype)
        loss_only = arc_margin_product(
            x, weight, label, scale=scale, margin=margin,
            easy_margin=easy_margin, ls_eps=ls_eps,
            block_b=block_b, block_c=block_c, min_b_blocks=min_b_blocks,
            matmul_dtype=matmul_dtype, return_logits=False)
        jax.block_until_ready((out, loss, loss_only))

        ref_out, ref_loss = _reference(
            x, weight, label, scale=scale, margin=margin,
            easy_margin=easy_margin, ls_eps=ls_eps)
        if check:
            assert np.allclose(np.asarray(out), np.asarray(ref_out),
                               rtol=1e-4, atol=1e-4), "logits mismatch"
            assert np.allclose(float(loss), float(ref_loss),
                               rtol=1e-4, atol=1e-4), "loss mismatch"
            assert np.allclose(float(loss_only), float(loss),
                               rtol=1e-5, atol=1e-5), "loss-only mismatch"
        else:
            assert np.isfinite(float(loss)) and np.isfinite(float(loss_only))

    # ArcMarginProduct(in_features=32, out_features=16), default knobs.
    run_case(8, 32, 16)
    # Multiple C tiles + class padding (exercises online logsumexp + last-tile mask).
    run_case(16, 64, 300, block_c=128)
    # Label-smoothing + easy-margin path (full-tile phi branch).
    run_case(8, 32, 16, ls_eps=0.1, easy_margin=True)
    # Multiple B tiles (v7x-style split of the parallel axis across cores).
    run_case(16, 32, 300, block_c=128, min_b_blocks=2)
    # bf16 MXU path (run + finiteness only; scale amplifies cosine error).
    run_case(16, 64, 300, block_c=128, matmul_dtype=jnp.bfloat16, check=False)

    print("KERNEL_OK")
</pallas_src>

<mosaic_0001>
module attributes {stable_mosaic.version = 11 : i64} {
  func.func @_arc_margin_kernel(%arg0: i32, %arg1: i32, %arg2: memref<8x32xf32, #tpu.memory_space<vmem>>, %arg3: memref<128x32xf32, #tpu.memory_space<vmem>>, %arg4: memref<1x128xf32, #tpu.memory_space<vmem>>, %arg5: memref<8x1xi32, #tpu.memory_space<vmem>>, %arg6: memref<8x128xf32, #tpu.memory_space<vmem>>, %arg7: memref<8x1xf32, #tpu.memory_space<vmem>>, %arg8: memref<8x1xf32, #tpu.memory_space<vmem>>, %arg9: memref<8x1xf32, #tpu.memory_space<vmem>>, %arg10: memref<8x1xf32, #tpu.memory_space<vmem>>, %arg11: memref<8x1xf32, #tpu.memory_space<vmem>>) attributes {dimension_semantics = [#tpu.dimension_semantics<parallel>, #tpu.dimension_semantics<arbitrary>], iteration_bounds = array<i64: 1, 1>, scalar_prefetch = 0 : i64, scratch_operands = 4 : i64, tpu.core_type = #tpu.core_type<tc>, window_params = [{transform_indices = @transform_0, window_bounds = array<i64: 8, 32>}, {transform_indices = @transform_1, window_bounds = array<i64: 128, 32>}, {transform_indices = @transform_2, window_bounds = array<i64: 1, 128>}, {transform_indices = @transform_3, window_bounds = array<i64: 8, 1>}, {transform_indices = @transform_4, window_bounds = array<i64: 8, 128>}, {transform_indices = @transform_5, window_bounds = array<i64: 8, 1>}]} {
    %c0_i32 = arith.constant 0 : i32
    %0 = arith.cmpi eq, %arg1, %c0_i32 : i32
    %1 = arith.extui %0 : i1 to i32
    %c0_i32_0 = arith.constant 0 : i32
    %2 = arith.cmpi ne, %1, %c0_i32_0 : i32
    scf.if %2 {
      %c0_36 = arith.constant 0 : index
      %c0_37 = arith.constant 0 : index
      %71 = vector.load %arg2[%c0_36, %c0_37] : memref<8x32xf32, #tpu.memory_space<vmem>>, vector<8x32xf32>
      %72 = arith.mulf %71, %71 : vector<8x32xf32>
      %cst_38 = arith.constant dense<0.000000e+00> : vector<8xf32>
      %73 = vector.multi_reduction <add>, %72, %cst_38 [1] : vector<8x32xf32> to vector<8xf32>
      %74 = vector.shape_cast %73 : vector<8xf32> to vector<8x1xf32>
      %cst_39 = arith.constant 1.000000e-24 : f32
      %75 = vector.broadcast %cst_39 : f32 to vector<8x1xf32>
      %76 = arith.maximumf %74, %75 : vector<8x1xf32>
      %77 = math.rsqrt %76 : vector<8x1xf32>
      %c0_40 = arith.constant 0 : index
      %c0_41 = arith.constant 0 : index
      %78 = vector.load %arg8[%c0_40, %c0_41] : memref<8x1xf32, #tpu.memory_space<vmem>>, vector<8x1xf32>
      tpu.vector_store %arg8[%c0_40, %c0_41], %77 {strides = array<i32>} : memref<8x1xf32, #tpu.memory_space<vmem>>, vector<8x1xf32>,
      %cst_42 = arith.constant 0xFF800000 : f32
      %79 = vector.broadcast %cst_42 : f32 to vector<8x1xf32>
      %c0_43 = arith.constant 0 : index
      %c0_44 = arith.constant 0 : index
      %80 = vector.load %arg9[%c0_43, %c0_44] : memref<8x1xf32, #tpu.memory_space<vmem>>, vector<8x1xf32>
      tpu.vector_store %arg9[%c0_43, %c0_44], %79 {strides = array<i32>} : memref<8x1xf32, #tpu.memory_space<vmem>>, vector<8x1xf32>,
      %cst_45 = arith.constant 0.000000e+00 : f32
      %81 = vector.broadcast %cst_45 : f32 to vector<8x1xf32>
      %c0_46 = arith.constant 0 : index
      %c0_47 = arith.constant 0 : index
      %82 = vector.load %arg10[%c0_46, %c0_47] : memref<8x1xf32, #tpu.memory_space<vmem>>, vector<8x1xf32>
      tpu.vector_store %arg10[%c0_46, %c0_47], %81 {strides = array<i32>} : memref<8x1xf32, #tpu.memory_space<vmem>>, vector<8x1xf32>,
      %cst_48 = arith.constant 0.000000e+00 : f32
      %83 = vector.broadcast %cst_48 : f32 to vector<8x1xf32>
      %c0_49 = arith.constant 0 : index
      %c0_50 = arith.constant 0 : index
      %84 = vector.load %arg11[%c0_49, %c0_50] : memref<8x1xf32, #tpu.memory_space<vmem>>, vector<8x1xf32>
      tpu.vector_store %arg11[%c0_49, %c0_50], %83 {strides = array<i32>} : memref<8x1xf32, #tpu.memory_space<vmem>>, vector<8x1xf32>,
    } else {
    }
    %c0 = arith.constant 0 : index
    %c0_1 = arith.constant 0 : index
    %3 = vector.load %arg2[%c0, %c0_1] : memref<8x32xf32, #tpu.memory_space<vmem>>, vector<8x32xf32>
    %c0_2 = arith.constant 0 : index
    %c0_3 = arith.constant 0 : index
    %4 = vector.load %arg3[%c0_2, %c0_3] : memref<128x32xf32, #tpu.memory_space<vmem>>, vector<128x32xf32>
    %cst = arith.constant dense<0.000000e+00> : vector<8x128xf32>
    %5 = tpu.matmul %3, %4, %cst {dimension_numbers = #tpu.dot_dimension_numbers<[1], [1], [0], [0], [0, 0, 1, 0], [], []>} : vector<8x32xf32>, vector<128x32xf32>, vector<8x128xf32> -> vector<8x128xf32>
    %c0_4 = arith.constant 0 : index
    %c0_5 = arith.constant 0 : index
    %6 = vector.load %arg8[%c0_4, %c0_5] : memref<8x1xf32, #tpu.memory_space<vmem>>, vector<8x1xf32>
    %7 = vector.broadcast %6 : vector<8x1xf32> to vector<8x128xf32>
    %8 = arith.mulf %5, %7 : vector<8x128xf32>
    %c0_6 = arith.constant 0 : index
    %c0_7 = arith.constant 0 : index
    %9 = vector.load %arg4[%c0_6, %c0_7] : memref<1x128xf32, #tpu.memory_space<vmem>>, vector<1x128xf32>
    %10 = vector.broadcast %9 : vector<1x128xf32> to vector<8x128xf32>
    %11 = arith.mulf %8, %10 : vector<8x128xf32>
    %c0_8 = arith.constant 0 : index
    %c0_9 = arith.constant 0 : index
    %12 = vector.load %arg5[%c0_8, %c0_9] : memref<8x1xi32, #tpu.memory_space<vmem>>, vector<8x1xi32>
    %c128_i32 = arith.constant 128 : i32
    %13 = arith.muli %arg1, %c128_i32 : i32
    %14 = tpu.iota {dimensions = array<i32: 1>} : vector<8x128xi32>
    %15 = vector.broadcast %13 : i32 to vector<8x128xi32>
    %16 = arith.addi %15, %14 : vector<8x128xi32>
    %17 = vector.broadcast %12 : vector<8x1xi32> to vector<8x128xi32>
    %18 = arith.cmpi eq, %16, %17 : vector<8x128xi32>
    %cst_10 = arith.constant 0.000000e+00 : f32
    %19 = vector.broadcast %cst_10 : f32 to vector<8x128xf32>
    %20 = arith.select %18, %11, %19 : vector<8x128xi1>, vector<8x128xf32>
    %cst_11 = arith.constant dense<0.000000e+00> : vector<8xf32>
    %21 = vector.multi_reduction <add>, %20, %cst_11 [1] : vector<8x128xf32> to vector<8xf32>
    %22 = vector.shape_cast %21 : vector<8xf32> to vector<8x1xf32>
    %c128_i32_12 = arith.constant 128 : i32
    %23 = arith.muli %arg1, %c128_i32_12 : i32
    %24 = vector.broadcast %23 : i32 to vector<8x1xi32>
    %25 = arith.cmpi sge, %12, %24 : vector<8x1xi32>
    %c1_i32 = arith.constant 1 : i32
    %26 = arith.addi %arg1, %c1_i32 : i32
    %c128_i32_13 = arith.constant 128 : i32
    %27 = arith.muli %26, %c128_i32_13 : i32
    %28 = vector.broadcast %27 : i32 to vector<8x1xi32>
    %29 = arith.cmpi slt, %12, %28 : vector<8x1xi32>
    %30 = arith.andi %25, %29 : vector<8x1xi1>
    %31 = arith.mulf %22, %22 : vector<8x1xf32>
    %cst_14 = arith.constant 1.000000e+00 : f32
    %32 = vector.broadcast %cst_14 : f32 to vector<8x1xf32>
    %33 = arith.subf %32, %31 : vector<8x1xf32>
    %cst_15 = arith.constant 0.000000e+00 : f32
    %cst_16 = arith.constant 1.000000e+00 : f32
    %34 = vector.broadcast %cst_15 : f32 to vector<8x1xf32>
    %35 = arith.maximumf %34, %33 : vector<8x1xf32>
    %36 = vector.broadcast %cst_16 : f32 to vector<8x1xf32>
    %37 = arith.minimumf %36, %35 : vector<8x1xf32>
    %38 = math.sqrt %37 : vector<8x1xf32>
    %cst_17 = arith.constant 0.87758255 : f32
    %39 = vector.broadcast %cst_17 : f32 to vector<8x1xf32>
    %40 = arith.mulf %22, %39 : vector<8x1xf32>
    %cst_18 = arith.constant 0.47942555 : f32
    %41 = vector.broadcast %cst_18 : f32 to vector<8x1xf32>
    %42 = arith.mulf %38, %41 : vector<8x1xf32>
    %43 = arith.subf %40, %42 : vector<8x1xf32>
    %cst_19 = arith.constant -0.87758255 : f32
    %44 = vector.broadcast %cst_19 : f32 to vector<8x1xf32>
    %45 = arith.cmpf ogt, %22, %44 : vector<8x1xf32>
    %cst_20 = arith.constant 0.239712775 : f32
    %46 = vector.broadcast %cst_20 : f32 to vector<8x1xf32>
    %47 = arith.subf %22, %46 : vector<8x1xf32>
    %48 = arith.select %45, %43, %47 : vector<8x1xi1>, vector<8x1xf32>
    %cst_21 = arith.constant 3.000000e+01 : f32
    %49 = vector.broadcast %cst_21 : f32 to vector<8x1xf32>
    %50 = arith.mulf %49, %48 : vector<8x1xf32>
    %cst_22 = arith.constant 3.000000e+01 : f32
    %51 = vector.broadcast %cst_22 : f32 to vector<8x128xf32>
    %52 = arith.mulf %51, %11 : vector<8x128xf32>
    %53 = vector.shape_cast %50 : vector<8x1xf32> to vector<8x1xf32>
    %54 = vector.broadcast %53 : vector<8x1xf32> to vector<8x128xf32>
    %55 = arith.select %18, %54, %52 : vector<8x128xi1>, vector<8x128xf32>
    %cst_23 = arith.constant 0.000000e+00 : f32
    %56 = vector.broadcast %cst_23 : f32 to vector<8x1xf32>
    %57 = arith.select %30, %50, %56 : vector<8x1xi1>, vector<8x1xf32>
    %c0_24 = arith.constant 0 : index
    %c0_25 = arith.constant 0 : index
    %58 = vector.load %arg6[%c0_24, %c0_25] : memref<8x128xf32, #tpu.memory_space<vmem>>, vector<8x128xf32>
    tpu.vector_store %arg6[%c0_24, %c0_25], %55 {strides = array<i32>} : memref<8x128xf32, #tpu.memory_space<vmem>>, vector<8x128xf32>,
    %c0_26 = arith.constant 0 : index
    %c0_27 = arith.constant 0 : index
    %59 = vector.load %arg11[%c0_26, %c0_27] : memref<8x1xf32, #tpu.memory_space<vmem>>, vector<8x1xf32>
    %60 = arith.addf %59, %57 : vector<8x1xf32>
    %c0_28 = arith.constant 0 : index
    %c0_29 = arith.constant 0 : index
    %61 = vector.load %arg11[%c0_28, %c0_29] : memref<8x1xf32, #tpu.memory_space<vmem>>, vector<8x1xf32>
    tpu.vector_store %arg11[%c0_28, %c0_29], %60 {strides = array<i32>} : memref<8x1xf32, #tpu.memory_space<vmem>>, vector<8x1xf32>,
    %c0_i32_30 = arith.constant 0 : i32
    %62 = arith.cmpi eq, %arg1, %c0_i32_30 : i32
    %63 = arith.extui %62 : i1 to i32
    %c0_i32_31 = arith.constant 0 : i32
    %64 = arith.cmpi ne, %63, %c0_i32_31 : i32
    scf.if %64 {
      %c16_i32 = arith.constant 16 : i32
      %71 = vector.broadcast %c16_i32 : i32 to vector<8x128xi32>
      %72 = arith.cmpi slt, %16, %71 : vector<8x128xi32>
      %cst_36 = arith.constant -1.000000e+30 : f32
      %73 = vector.broadcast %cst_36 : f32 to vector<8x128xf32>
      %74 = arith.select %72, %55, %73 : vector<8x128xi1>, vector<8x128xf32>
      %c0_37 = arith.constant 0 : index
      %c0_38 = arith.constant 0 : index
      %75 = vector.load %arg9[%c0_37, %c0_38] : memref<8x1xf32, #tpu.memory_space<vmem>>, vector<8x1xf32>
      %cst_39 = arith.constant dense<0xFF800000> : vector<8xf32>
      %76 = vector.multi_reduction <maximumf>, %74, %cst_39 [1] : vector<8x128xf32> to vector<8xf32>
      %77 = vector.shape_cast %76 : vector<8xf32> to vector<8x1xf32>
      %78 = arith.maximumf %75, %77 : vector<8x1xf32>
      %c0_40 = arith.constant 0 : index
      %c0_41 = arith.constant 0 : index
      %79 = vector.load %arg10[%c0_40, %c0_41] : memref<8x1xf32, #tpu.memory_space<vmem>>, vector<8x1xf32>
      %80 = arith.subf %75, %78 : vector<8x1xf32>
      %81 = math.exp %80 : vector<8x1xf32>
      %82 = arith.mulf %79, %81 : vector<8x1xf32>
      %83 = vector.broadcast %78 : vector<8x1xf32> to vector<8x128xf32>
      %84 = arith.subf %74, %83 : vector<8x128xf32>
      %85 = math.exp %84 : vector<8x128xf32>
      %cst_42 = arith.constant dense<0.000000e+00> : vector<8xf32>
      %86 = vector.multi_reduction <add>, %85, %cst_42 [1] : vector<8x128xf32> to vector<8xf32>
      %87 = vector.shape_cast %86 : vector<8xf32> to vector<8x1xf32>
      %88 = arith.addf %82, %87 : vector<8x1xf32>
      %c0_43 = arith.constant 0 : index
      %c0_44 = arith.constant 0 : index
      %89 = vector.load %arg10[%c0_43, %c0_44] : memref<8x1xf32, #tpu.memory_space<vmem>>, vector<8x1xf32>
      tpu.vector_store %arg10[%c0_43, %c0_44], %88 {strides = array<i32>} : memref<8x1xf32, #tpu.memory_space<vmem>>, vector<8x1xf32>,
      %c0_45 = arith.constant 0 : index
      %c0_46 = arith.constant 0 : index
      %90 = vector.load %arg9[%c0_45, %c0_46] : memref<8x1xf32, #tpu.memory_space<vmem>>, vector<8x1xf32>
      tpu.vector_store %arg9[%c0_45, %c0_46], %78 {strides = array<i32>} : memref<8x1xf32, #tpu.memory_space<vmem>>, vector<8x1xf32>,
    } else {
    }
    %c0_i32_32 = arith.constant 0 : i32
    %65 = arith.cmpi ne, %arg1, %c0_i32_32 : i32
    %66 = arith.extui %65 : i1 to i32
    %c0_i32_33 = arith.constant 0 : i32
    %67 = arith.cmpi ne, %66, %c0_i32_33 : i32
    scf.if %67 {
      %c0_36 = arith.constant 0 : index
      %c0_37 = arith.constant 0 : index
      %71 = vector.load %arg9[%c0_36, %c0_37] : memref<8x1xf32, #tpu.memory_space<vmem>>, vector<8x1xf32>
      %cst_38 = arith.constant dense<0xFF800000> : vector<8xf32>
      %72 = vector.multi_reduction <maximumf>, %55, %cst_38 [1] : vector<8x128xf32> to vector<8xf32>
      %73 = vector.shape_cast %72 : vector<8xf32> to vector<8x1xf32>
      %74 = arith.maximumf %71, %73 : vector<8x1xf32>
      %c0_39 = arith.constant 0 : index
      %c0_40 = arith.constant 0 : index
      %75 = vector.load %arg10[%c0_39, %c0_40] : memref<8x1xf32, #tpu.memory_space<vmem>>, vector<8x1xf32>
      %76 = arith.subf %71, %74 : vector<8x1xf32>
      %77 = math.exp %76 : vector<8x1xf32>
      %78 = arith.mulf %75, %77 : vector<8x1xf32>
      %79 = vector.broadcast %74 : vector<8x1xf32> to vector<8x128xf32>
      %80 = arith.subf %55, %79 : vector<8x128xf32>
      %81 = math.exp %80 : vector<8x128xf32>
      %cst_41 = arith.constant dense<0.000000e+00> : vector<8xf32>
      %82 = vector.multi_reduction <add>, %81, %cst_41 [1] : vector<8x128xf32> to vector<8xf32>
      %83 = vector.shape_cast %82 : vector<8xf32> to vector<8x1xf32>
      %84 = arith.addf %78, %83 : vector<8x1xf32>
      %c0_42 = arith.constant 0 : index
      %c0_43 = arith.constant 0 : index
      %85 = vector.load %arg10[%c0_42, %c0_43] : memref<8x1xf32, #tpu.memory_space<vmem>>, vector<8x1xf32>
      tpu.vector_store %arg10[%c0_42, %c0_43], %84 {strides = array<i32>} : memref<8x1xf32, #tpu.memory_space<vmem>>, vector<8x1xf32>,
      %c0_44 = arith.constant 0 : index
      %c0_45 = arith.constant 0 : index
      %86 = vector.load %arg9[%c0_44, %c0_45] : memref<8x1xf32, #tpu.memory_space<vmem>>, vector<8x1xf32>
      tpu.vector_store %arg9[%c0_44, %c0_45], %74 {strides = array<i32>} : memref<8x1xf32, #tpu.memory_space<vmem>>, vector<8x1xf32>,
    } else {
    }
    %c0_i32_34 = arith.constant 0 : i32
    %68 = arith.cmpi eq, %arg1, %c0_i32_34 : i32
    %69 = arith.extui %68 : i1 to i32
    %c0_i32_35 = arith.constant 0 : i32
    %70 = arith.cmpi ne, %69, %c0_i32_35 : i32
    scf.if %70 {
      %c0_36 = arith.constant 0 : index
      %c0_37 = arith.constant 0 : index
      %71 = vector.load %arg9[%c0_36, %c0_37] : memref<8x1xf32, #tpu.memory_space<vmem>>, vector<8x1xf32>
      %c0_38 = arith.constant 0 : index
      %c0_39 = arith.constant 0 : index
      %72 = vector.load %arg10[%c0_38, %c0_39] : memref<8x1xf32, #tpu.memory_space<vmem>>, vector<8x1xf32>
      %73 = math.log %72 : vector<8x1xf32>
      %74 = arith.addf %71, %73 : vector<8x1xf32>
      %c0_40 = arith.constant 0 : index
      %c0_41 = arith.constant 0 : index
      %75 = vector.load %arg11[%c0_40, %c0_41] : memref<8x1xf32, #tpu.memory_space<vmem>>, vector<8x1xf32>
      %76 = arith.subf %74, %75 : vector<8x1xf32>
      %c0_42 = arith.constant 0 : index
      %c0_43 = arith.constant 0 : index
      %77 = vector.load %arg7[%c0_42, %c0_43] : memref<8x1xf32, #tpu.memory_space<vmem>>, vector<8x1xf32>
      tpu.vector_store %arg7[%c0_42, %c0_43], %76 {strides = array<i32>} : memref<8x1xf32, #tpu.memory_space<vmem>>, vector<8x1xf32>,
    } else {
    }
    return
  }
  func.func @transform_0(%arg0: i32, %arg1: i32) -> (i32, i32) {
    %c0_i32 = arith.constant 0 : i32
    %c0_i32_0 = arith.constant 0 : i32
    return %arg0, %c0_i32 : i32, i32
  }
  func.func @transform_1(%arg0: i32, %arg1: i32) -> (i32, i32) {
    %c0_i32 = arith.constant 0 : i32
    %c0_i32_0 = arith.constant 0 : i32
    return %arg1, %c0_i32 : i32, i32
  }
  func.func @transform_2(%arg0: i32, %arg1: i32) -> (i32, i32) {
    %c0_i32 = arith.constant 0 : i32
    %c0_i32_0 = arith.constant 0 : i32
    return %c0_i32, %arg1 : i32, i32
  }
  func.func @transform_3(%arg0: i32, %arg1: i32) -> (i32, i32) {
    %c0_i32 = arith.constant 0 : i32
    %c0_i32_0 = arith.constant 0 : i32
    return %arg0, %c0_i32 : i32, i32
  }
  func.func @transform_4(%arg0: i32, %arg1: i32) -> (i32, i32) {
    %c0_i32 = arith.constant 0 : i32
    return %arg0, %arg1 : i32, i32
  }
  func.func @transform_5(%arg0: i32, %arg1: i32) -> (i32, i32) {
    %c0_i32 = arith.constant 0 : i32
    %c0_i32_0 = arith.constant 0 : i32
    return %arg0, %c0_i32 : i32, i32
  }
}

</mosaic_0001>

<bundles_post_ra>
// kernel: tpu_custom_call.1
= control target key start
LH: loop header
LB: loop body
LE: loop exit
PB: predicated region body
PF: predicated region fallthrough
CT: control target
= control target key end

     0   :  { %vm26_vm0 = vcmask 261120   ;;  %s468_s0 = inlined_call_operand.vmem [shape: f32[8,32], index: 0, kind: input, shape index: {}]   ;;  %s469_s1 = inlined_call_operand.vmem [shape: f32[128,32], index: 1, kind: input, shape index: {}]   ;;  %s470_s2 = inlined_call_operand.vmem [shape: f32[1,128], index: 2, kind: input, shape index: {}]   ;;  %s471_s3 = inlined_call_operand.vmem [shape: s32[8,1], index: 3, kind: input, shape index: {}]   ;;  %s472_s4 = inlined_call_operand.hbm [shape: f32[8,128], index: 4, kind: output, shape index: {0}]   ;;  %s473_s5 = inlined_call_operand.vmem [shape: f32[8,1], index: 5, kind: output, shape index: {1}]  }
   0x1   :  { %v24_v0 = vld [vmem:[%s468_s0] sm:$0xff]  ;;  %v62_v1 = vld [vmem:[%s469_s1 + $0x78] sm:$0xff]  ;;  %v61_v3 = vld [vmem:[%s469_s1 + $0x70] sm:$0xff] }
   0x2   :  { %v25_v2 = vmul.f32 %v24_v0, %v24_v0  ;;  %281 = vmatpush.xpose.msk.msra.mxu0 %vm26_vm0, %v62_v1 }
   0x4   :  { %v27_v4 = vsel %vm26_vm0, %v25_v2, 0.0 }
   0x5   :  { %28 = vadd.xlane.f32.xlu0 %v27_v4 }
   0x6   :  { %11 = vsyncpa [#allocation7], 0  ;;  %282 = vmatpush.xpose.msk.msra.mxu0 %vm26_vm0, %v61_v3  ;;  %v60_v5 = vld [vmem:[%s469_s1 + $0x68] sm:$0xff]  ;;  %v59_v6 = vld [vmem:[%s469_s1 + $0x60] sm:$0xff]  ;;  %v343_v19 = vmov 0   ;;  %vm41_vm2 = vcmask 7168   ;;  %v149_v31 = vlaneseq }
   0x7   :  { %v58_v7 = vld [vmem:[%s469_s1 + $0x58] sm:$0xff]  ;;  %v57_v8 = vld [vmem:[%s469_s1 + $0x50] sm:$0xff]  ;;  %v56_v9 = vld [vmem:[%s469_s1 + $0x48] sm:$0xff]  ;;  %303 = vset.pattern.permute.xlu0 %v343_v19  ;;  %304 = vset.pattern.permute.xlu1 %v343_v19  ;;  %v344_v40 = vmov 0.0   ;;  %v345_v48 = vmov -inf   ;;  %s268_s30 = sshll.u32 %s472_s4, 4  ;;  %s269_s30 = int_to_ptr.hbm [resolvable:$true] %s268_s30 }
   0x8   :  { %v55_v10 = vld [vmem:[%s469_s1 + $0x40] sm:$0xff]  ;;  %v54_v11 = vld [vmem:[%s469_s1 + $0x38] sm:$0xff]  ;;  %v53_v12 = vld [vmem:[%s469_s1 + $0x30] sm:$0xff]  ;;  %305 = vset.pattern.permute.xlu2 %v343_v19  ;;  %v150_v33 = vand.u32 127, %v149_v31  ;;  %45 = vst.msk [vmem:[#allocation5] sm:$0xff] %vm41_vm2, %v344_v40 }
   0x9   :  { %v52_v13 = vld [vmem:[%s469_s1 + $0x28] sm:$0xff]  ;;  %v51_v14 = vld [vmem:[%s469_s1 + $0x20] sm:$0xff]  ;;  %v50_v15 = vld [vmem:[%s469_s1 + $0x18] sm:$0xff]  ;;  %44 = vst.msk [vmem:[#allocation4] sm:$0xff] %vm41_vm2, %v344_v40 }
   0xa   :  { %283 = vmatpush.xpose.msk.msra.mxu0 %vm26_vm0, %v60_v5  ;;  %v49_v16 = vld [vmem:[%s469_s1 + $0x10] sm:$0xff]  ;;  %v48_v17 = vld [vmem:[%s469_s1 + $0x8] sm:$0xff]  ;;  %v47_v18 = vld [vmem:[%s469_s1] sm:$0xff]  ;;  %43 = vst.msk [vmem:[#allocation3] sm:$0xff] %vm41_vm2, %v345_v48  ;;  %vm200_vm12 = vcmp.lt.s32.totalorder %v150_v33, 16 }
   0xb   :  { %v147_v20 = vld [vmem:[%s471_s3] sm:$0xff] }
   0xc   :  { %154 = vperm.xlu1 %304, %v147_v20   ;;  %v306_v35 = vld [vmem:[%s470_s2] ss:$0 sm:$0xff]  ;;  %vm160_vm8 = vcmp.ge.s32.totalorder %v147_v20, 0  ;;  %vm164_vm9 = vcmp.lt.s32.totalorder %v147_v20, 128  ;;  %s346_s2 = smov [#allocation6]  }
   0xd   :  { %vm165_vm11 = vmand %vm160_vm8, %vm164_vm9  ;;  %s266_s27 = sshll.u32 %s346_s2, 4  ;;  %s267_s27 = int_to_ptr.vmem [resolvable:$true] %s266_s27 }
   0xe   :  { %284 = vmatpush.xpose.msk.msra.mxu0 %vm26_vm0, %v59_v6 }
  0x11   :  { %v202_v5 = vld [vmem:[#allocation3] sm:$0xff] }
  0x12   :  { %285 = vmatpush.xpose.msk.msra.mxu0 %vm26_vm0, %v58_v7 }
  0x16   :  { %286 = vmatpush.xpose.msk.msra.mxu0 %vm26_vm0, %v57_v8 }
  0x1a   :  { %287 = vmatpush.xpose.msk.msra.mxu0 %vm26_vm0, %v56_v9 }
  0x1e   :  { %288 = vmatpush.xpose.msk.msra.mxu0 %vm26_vm0, %v55_v10 }
  0x22   :  { %289 = vmatpush.xpose.msk.msra.mxu0 %vm26_vm0, %v54_v11 }
  0x26   :  { %290 = vmatpush.xpose.msk.msra.mxu0 %vm26_vm0, %v53_v12 }
  0x2a   :  { %291 = vmatpush.xpose.msk.msra.mxu0 %vm26_vm0, %v52_v13 }
  0x2e   :  { %292 = vmatpush.xpose.msk.msra.mxu0 %vm26_vm0, %v51_v14 }
  0x32   :  { %293 = vmatpush.xpose.msk.msra.mxu0 %vm26_vm0, %v50_v15  ;;  %v206_v15 = vld [vmem:[#allocation4] sm:$0xff] }
  0x36   :  { %294 = vmatpush.xpose.msk.msra.mxu0 %vm26_vm0, %v49_v16 }
  0x3a   :  { %295 = vmatpush.xpose.msk.msra.mxu0 %vm26_vm0, %v48_v17 }
  0x3e   :  { %296 = vmatpush.xpose.msk.msra.mxu0 %vm26_vm0, %v47_v18 }
  0x41   :  { %297 = vmatmul.msk.f32.vlgmr.msra.gmra.mxu0 %vm26_vm0, %v24_v0  ;;  %v193_v0 = vld [vmem:[#allocation5] sm:$0xff] }
  0x78   :  { %v29_v21 = vpop.xlane.xlu0 %28 }
  0x79   :  { %v30_v22 = vmax.f32 %v29_v21, 1e-24 }
  0x7b   :  { %307 = vrsqrt.f32 %v30_v22  ;;  %vm37_vm3 = vweird.f32 %v30_v22 }
  0x7e   :  { %v155_v34 = vpop.permute.xlu1 %154 }
  0x7f   :  { %vm156_vm5 = vcmp.eq.s32.totalorder %v150_v33, %v155_v34 }
  0x81   :  { %v308_v23 = vpop.eup %307 }
  0x82   :  { %v32_v24 = vmul.f32 %v308_v23, %v30_v22  ;;  %vm38_vm1 = vweird.f32 %v308_v23 }
  0x83   :  { %vm39_vm4 = vmor %vm37_vm3, %vm38_vm1 }
  0x84   :  { %v33_v25 = vmul.f32 %v308_v23, %v32_v24 }
  0x86   :  { %v34_v26 = vmul.f32 0.5, %v33_v25 }
  0x88   :  { %v35_v27 = vsub.f32 1.5, %v34_v26 }
  0x8a   :  { %v36_v28 = vmul.f32 %v308_v23, %v35_v27 }
  0x8c   :  { %v40_v29 = vsel %vm39_vm4, %v308_v23, %v36_v28 }
  0x8d   :  { %42 = vst.msk [vmem:[#allocation2] sm:$0xff] %vm41_vm2, %v40_v29 }
  0x94   :  { %v135_v30 = vld [vmem:[#allocation2] sm:$0xff] }
  0x95   :  { %138 = vperm.xlu0 %303, %v135_v30  }
  0xbe   :  { %v132_v32 = vpop.f32.mrf.mxu0 }
 0x107   :  { %v139_v36 = vpop.permute.xlu0 %138 }
 0x108   :  { %v141_v37 = vmul.f32 %v139_v36, %v132_v32 }
 0x10a   :  { %v146_v38 = vmul.f32 %v306_v35, %v141_v37 }
 0x10c   :  { %v157_v39 = vsel %vm156_vm5, %v146_v38, 0.0  ;;  %v189_v62 = vmul.f32 30.0, %v146_v38 }
 0x10d   :  { %158 = vadd.xlane.f32.xlu1 %v157_v39 }
 0x180   :  { %v159_v41 = vpop.xlane.xlu1 %158 }
 0x181   :  { %v166_v42 = vmul.f32 %v159_v41, %v159_v41  ;;  %v182_v57 = vmul.f32 0.87758255, %v159_v41  ;;  %v298_v60 = vadd.f32 -0.23971277, %v159_v41  ;;  %vm185_vm10 = vcmp.gt.f32.partialorder %v159_v41, -0.87758255 }
 0x183   :  { %v167_v43 = vsub.f32 1.0, %v166_v42 }
 0x185   :  { %v168_v44 = vmax.f32 %v167_v43, 0.0 }
 0x187   :  { %v169_v45 = vmin.f32 %v168_v44, 1.0 }
 0x189   :  { %309 = vrsqrt.f32 %v169_v45  ;;  %vm177_vm6 = vcmp.eq.f32.partialorder %v169_v45, inf  ;;  %v180_v54 = vand.u32 2147483648, %v169_v45  ;;  %vm179_vm7 = vcmp.eq.f32.partialorder %v169_v45, 0.0 }
 0x18f   :  { %v310_v46 = vpop.eup %309 }
 0x190   :  { %v171_v47 = vmul.f32 %v310_v46, %v169_v45 }
 0x192   :  { %v172_v49 = vmul.f32 %v310_v46, %v171_v47 }
 0x194   :  { %v173_v50 = vmul.f32 0.5, %v172_v49 }
 0x196   :  { %v174_v51 = vsub.f32 1.5, %v173_v50 }
 0x198   :  { %v175_v52 = vmul.f32 %v310_v46, %v174_v51 }
 0x19a   :  { %v176_v53 = vmul.f32 %v175_v52, %v169_v45 }
 0x19c   :  { %v178_v55 = vsel %vm177_vm6, %v169_v45, %v176_v53 }
 0x19d   :  { %v181_v56 = vsel %vm179_vm7, %v180_v54, %v178_v55 }
 0x19e   :  { %v183_v58 = vmul.f32 0.47942555, %v181_v56 }
 0x1a0   :  { %v184_v59 = vsub.f32 %v182_v57, %v183_v58 }
 0x1a2   :  { %v187_v61 = vsel %vm185_vm10, %v184_v59, %v298_v60 }
 0x1a3   :  { %v188_v63 = vmul.f32 30.0, %v187_v61 }
 0x1a5   :  { %v190_v1 = vsel %vm156_vm5, %v188_v63, %v189_v62  ;;  %v191_v2 = vsel %vm165_vm11, %v188_v63, 0.0 }
 0x1a6   :  { %v194_v3 = vadd.f32 %v193_v0, %v191_v2  ;;  %v201_v4 = vsel %vm200_vm12, %v190_v1, -1e+30  ;;  %192 = vst [vmem:[#allocation6] sm:$0xff] %v190_v1 }
 0x1a7   :  { %203 = vmax.xlane.f32.xlu2 %v201_v4  ;;  %271 = dma.vmem_to_hbm [thread:$0]  %s267_s27, 128, %s269_s30, [#allocation7]  }
 0x1a8   :  { %196 = vst.msk [vmem:[#allocation5] sm:$0xff] %vm41_vm2, %v194_v3 }
 0x1af   :  { %v258_v24 = vld [vmem:[#allocation5] sm:$0xff] }
 0x21a   :  { %v204_v6 = vpop.xlane.xlu2 %203 }
 0x21b   :  { %v205_v7 = vmax.f32 %v202_v5, %v204_v6 }
 0x21d   :  { %v207_v8 = vsub.f32 %v202_v5, %v205_v7  ;;  %223 = vst.msk [vmem:[#allocation3] sm:$0xff] %vm41_vm2, %v205_v7  ;;  %213 = vperm.xlu2 %305, %v205_v7  }
 0x21f   :  { %v208_v13 = vmul.f32 1.442695, %v207_v8 }
 0x224   :  { %v253_v22 = vld [vmem:[#allocation3] sm:$0xff] }
 0x277   :  { %v214_v9 = vpop.permute.xlu2 %213 }
 0x278   :  { %v216_v10 = vsub.f32 %v201_v4, %v214_v9 }
 0x27a   :  { %v217_v11 = vmul.f32 1.442695, %v216_v10 }
 0x27c   :  { %311 = vpow2.f32 %v217_v11 }
 0x27d   :  { %313 = vpow2.f32 %v208_v13 }
 0x282   :  { %v312_v12 = vpop.eup %311 }
 0x283   :  { %219 = vadd.xlane.f32.xlu2 %v312_v12  ;;  %v314_v14 = vpop.eup %313 }
 0x284   :  { %v210_v16 = vmul.f32 %v314_v14, %v206_v15 }
 0x2f6   :  { %v220_v17 = vpop.xlane.xlu2 %219 }
 0x2f7   :  { %v221_v18 = vadd.f32 %v220_v17, %v210_v16 }
 0x2f9   :  { %222 = vst.msk [vmem:[#allocation4] sm:$0xff] %vm41_vm2, %v221_v18 }
 0x300   :  { %v254_v19 = vld [vmem:[#allocation4] sm:$0xff] }
 0x301   :  { %315 = vlog2.f32 %v254_v19 }
 0x307   :  { %v316_v20 = vpop.eup %315 }
 0x308   :  { %v256_v21 = vmul.f32 0.6931472, %v316_v20 }
 0x30a   :  { %v257_v23 = vadd.f32 %v256_v21, %v253_v22 }
 0x30c   :  { %v259_v25 = vsub.f32 %v257_v23, %v258_v24 }
 0x30e   :  { %260 = vst.msk [vmem:[%s473_s5] sm:$0xff] %vm41_vm2, %v259_v25 }
 0x30f   :  { %341 = dma.done.wait [#allocation7], 128  }
 0x310   :  { %342 = vsyncadd [#allocation7], 4294967168 }
 0x311   :  { %280 = vsyncpa [#allocation7], 1 }

</bundles_post_ra>
